<compile_context>
chip_gen: v7x
topology: tpu7x:2x2x1
jax: 0.10.0
libtpu: 0.0.40
codegen_flags: <defaults>
</compile_context>

<pallas_src>
import jax
import jax.numpy as jnp
from jax.experimental import pallas as pl
from jax.experimental.pallas import tpu as pltpu


def _round_up(x: int, m: int) -> int:
    return ((x + m - 1) // m) * m


def _bits_to_uniform(bits_i32):
    """int32 random bits -> float32 uniform in [0, 1) with 23-bit granularity.

    Only jnp ops, so the exact same math runs inside the Pallas kernel and in the
    pure-JAX reference check.
    """
    mant = jnp.right_shift(jnp.bitwise_and(bits_i32, jnp.int32(0x7FFFFFFF)), 8)
    return mant.astype(jnp.float32) * jnp.float32(1.0 / (1 << 23))


def _mock_sc_bert_kernel(bits_ref, w_ref, b_ref, out_ref):
    """bits_ref: VMEM (TB, E_pad) int32   -- random bits for the mock-encoder tile
       w_ref   : VMEM (E_pad, C_pad) bf16 -- zero-padded, transposed classifier weight
       b_ref   : VMEM (1, C_pad) f32      -- zero-padded bias
       out_ref : VMEM (TB, C_pad) f32     -- logits tile (lane-dense)
    """
    # MockEncoder: uniform [0,1) embeddings built from the random bits.
    mock = _bits_to_uniform(bits_ref[...])
    # classifier: Linear(embed_dim, n_classes); bf16 MXU inputs, f32 accumulation.
    logits = jnp.dot(mock.astype(jnp.bfloat16), w_ref[...],
                     preferred_element_type=jnp.float32)
    out_ref[...] = logits + b_ref[...]


def mock_sc_bert_forward(input_ids, attention_mask, w, b, key, *, max_batch_tile=256):
    """Mirrors MockSC_BERT.forward(input_ids, attention_mask).

    input_ids / attention_mask are only used for the batch size (as in the mock).
    w: (n_classes, embed_dim) classifier weight, b: (n_classes,) bias,
    key: PRNG key for the mock encoder randomness.

    Returns (logits (batch, n_classes) f32, mock_bits (B_pad, E_pad) int32); the bits
    are returned so callers can reproduce the in-kernel computation exactly.
    """
    del attention_mask  # unused by the mock encoder
    batch = input_ids.shape[0]
    n_classes, embed_dim = w.shape

    # Padded, MXU/lane-aligned shapes.
    e_pad = _round_up(embed_dim, 128)
    c_pad = _round_up(n_classes, 128)
    b_pad = _round_up(max(batch, 8), 8)
    if b_pad <= max_batch_tile:
        tb = b_pad
    else:
        tb = max_batch_tile
        b_pad = _round_up(b_pad, tb)
    grid = (b_pad // tb,)

    # MockEncoder randomness: portable bit source; bits -> uniform happens in-kernel.
    bits_u32 = jax.random.bits(key, (b_pad, e_pad), dtype=jnp.uint32)
    bits_i32 = jax.lax.bitcast_convert_type(bits_u32, jnp.int32)

    # Zero-padded, pre-transposed bf16 weight (E_pad, C_pad) and f32 bias (1, C_pad).
    w_t = jnp.zeros((e_pad, c_pad), jnp.float32)
    w_t = w_t.at[:embed_dim, :n_classes].set(w.T.astype(jnp.float32))
    w_t_bf16 = w_t.astype(jnp.bfloat16)
    b2d = jnp.zeros((1, c_pad), jnp.float32).at[:, :n_classes].set(
        b.astype(jnp.float32))

    cost = pl.CostEstimate(
        flops=2 * b_pad * e_pad * c_pad,
        transcendentals=0,
        bytes_accessed=(4 * b_pad * e_pad          # random bits in
                        + 2 * e_pad * c_pad        # bf16 weight
                        + 4 * c_pad                # bias
                        + 4 * b_pad * c_pad),      # logits out
    )

    out = pl.pallas_call(
        _mock_sc_bert_kernel,
        out_shape=jax.ShapeDtypeStruct((b_pad, c_pad), jnp.float32),
        grid=grid,
        in_specs=[
            pl.BlockSpec((tb, e_pad), lambda i: (i, 0)),      # bits: batch-tiled
            pl.BlockSpec((e_pad, c_pad), lambda i: (0, 0)),   # W^T : VMEM-resident
            pl.BlockSpec((1, c_pad), lambda i: (0, 0)),       # bias: VMEM-resident
        ],
        out_specs=pl.BlockSpec((tb, c_pad), lambda i: (i, 0)),
        compiler_params=pltpu.CompilerParams(
            dimension_semantics=("parallel",)),
        cost_estimate=cost,
    )(bits_i32, w_t_bf16, b2d)

    return out[:batch, :n_classes], bits_i32


if __name__ == "__main__":
    # Small shapes consistent with the module: batch=2, seq=8, embed_dim=32, classes=4.
    batch, seq_len = 2, 8
    embed_dim, n_classes = 32, 4

    key = jax.random.PRNGKey(0)
    k_ids, k_w, k_b, k_mock = jax.random.split(key, 4)

    # Token ids / mask (contents irrelevant to the mock, only batch size matters).
    input_ids = jax.random.randint(k_ids, (batch, seq_len), 0, 1000, dtype=jnp.int32)
    attention_mask = jnp.ones((batch, seq_len), dtype=jnp.int32)

    # PyTorch nn.Linear-style init: U(-1/sqrt(in_features), 1/sqrt(in_features)).
    bound = 1.0 / (embed_dim ** 0.5)
    w = jax.random.uniform(k_w, (n_classes, embed_dim), jnp.float32, -bound, bound)
    b = jax.random.uniform(k_b, (n_classes,), jnp.float32, -bound, bound)

    logits, mock_bits = mock_sc_bert_forward(input_ids, attention_mask, w, b, k_mock)
    logits = jax.block_until_ready(logits)

    assert logits.shape == (batch, n_classes)
    assert logits.dtype == jnp.float32
    assert bool(jnp.all(jnp.isfinite(logits)))

    # Pure-JAX reference reproducing the exact in-kernel math (same bits, same casts).
    mock_data = _bits_to_uniform(mock_bits)[:batch, :embed_dim]
    ref = jnp.dot(mock_data.astype(jnp.bfloat16), w.T.astype(jnp.bfloat16),
                  preferred_element_type=jnp.float32) + b[None, :]
    assert bool(jnp.allclose(logits, ref, rtol=1e-4, atol=1e-4))

    # Sanity: mock embeddings in [0,1) => |logits| <= sum|W| + |b| (+ bf16 slack).
    max_bound = jnp.sum(jnp.abs(w), axis=1) + jnp.abs(b)
    assert bool(jnp.all(jnp.abs(logits) <= max_bound[None, :] + 1e-2))

    print("KERNEL_OK")
</pallas_src>

<mosaic_0001>
module attributes {stable_mosaic.version = 11 : i64} {
  func.func @_mock_sc_bert_kernel(%arg0: i32, %arg1: memref<8x128xi32, #tpu.memory_space<vmem>>, %arg2: memref<128x128xbf16, #tpu.memory_space<vmem>>, %arg3: memref<1x128xf32, #tpu.memory_space<vmem>>, %arg4: memref<8x128xf32, #tpu.memory_space<vmem>>) attributes {dimension_semantics = [#tpu.dimension_semantics<parallel>], iteration_bounds = array<i64: 1>, scalar_prefetch = 0 : i64, scratch_operands = 0 : i64, tpu.core_type = #tpu.core_type<tc>, window_params = [{transform_indices = @transform_0, window_bounds = array<i64: 8, 128>}, {pipeline_mode = #tpu.pipeline_mode<synchronous>, transform_indices = @transform_1, window_bounds = array<i64: 128, 128>}, {pipeline_mode = #tpu.pipeline_mode<synchronous>, transform_indices = @transform_2, window_bounds = array<i64: 1, 128>}, {transform_indices = @transform_3, window_bounds = array<i64: 8, 128>}]} {
    %c0 = arith.constant 0 : index
    %c0_0 = arith.constant 0 : index
    %0 = vector.load %arg1[%c0, %c0_0] : memref<8x128xi32, #tpu.memory_space<vmem>>, vector<8x128xi32>
    %c2147483647_i32 = arith.constant 2147483647 : i32
    %1 = vector.broadcast %c2147483647_i32 : i32 to vector<8x128xi32>
    %2 = arith.andi %0, %1 : vector<8x128xi32>
    %c8_i32 = arith.constant 8 : i32
    %3 = vector.broadcast %c8_i32 : i32 to vector<8x128xi32>
    %4 = arith.shrsi %2, %3 : vector<8x128xi32>
    %5 = arith.sitofp %4 : vector<8x128xi32> to vector<8x128xf32>
    %cst = arith.constant 1.1920929E-7 : f32
    %6 = vector.broadcast %cst : f32 to vector<8x128xf32>
    %7 = arith.mulf %5, %6 : vector<8x128xf32>
    %8 = arith.truncf %7 : vector<8x128xf32> to vector<8x128xbf16>
    %c0_1 = arith.constant 0 : index
    %c0_2 = arith.constant 0 : index
    %9 = vector.load %arg2[%c0_1, %c0_2] : memref<128x128xbf16, #tpu.memory_space<vmem>>, vector<128x128xbf16>
    %cst_3 = arith.constant dense<0.000000e+00> : vector<8x128xf32>
    %10 = tpu.matmul %8, %9, %cst_3 {dimension_numbers = #tpu.dot_dimension_numbers<[1], [0], [0], [1], [0, 0, 1, 1], [], []>} : vector<8x128xbf16>, vector<128x128xbf16>, vector<8x128xf32> -> vector<8x128xf32>
    %c0_4 = arith.constant 0 : index
    %c0_5 = arith.constant 0 : index
    %11 = vector.load %arg3[%c0_4, %c0_5] : memref<1x128xf32, #tpu.memory_space<vmem>>, vector<1x128xf32>
    %12 = vector.broadcast %11 : vector<1x128xf32> to vector<8x128xf32>
    %13 = arith.addf %10, %12 : vector<8x128xf32>
    %c0_6 = arith.constant 0 : index
    %c0_7 = arith.constant 0 : index
    %14 = vector.load %arg4[%c0_6, %c0_7] : memref<8x128xf32, #tpu.memory_space<vmem>>, vector<8x128xf32>
    tpu.vector_store %arg4[%c0_6, %c0_7], %13 {strides = array<i32>} : memref<8x128xf32, #tpu.memory_space<vmem>>, vector<8x128xf32>,
    return
  }
  func.func @transform_0(%arg0: i32) -> (i32, i32) {
    %c0_i32 = arith.constant 0 : i32
    %c0_i32_0 = arith.constant 0 : i32
    return %arg0, %c0_i32 : i32, i32
  }
  func.func @transform_1(%arg0: i32) -> (i32, i32) {
    %c0_i32 = arith.constant 0 : i32
    %c0_i32_0 = arith.constant 0 : i32
    %c0_i32_1 = arith.constant 0 : i32
    return %c0_i32, %c0_i32_0 : i32, i32
  }
  func.func @transform_2(%arg0: i32) -> (i32, i32) {
    %c0_i32 = arith.constant 0 : i32
    %c0_i32_0 = arith.constant 0 : i32
    %c0_i32_1 = arith.constant 0 : i32
    return %c0_i32, %c0_i32_0 : i32, i32
  }
  func.func @transform_3(%arg0: i32) -> (i32, i32) {
    %c0_i32 = arith.constant 0 : i32
    %c0_i32_0 = arith.constant 0 : i32
    return %arg0, %c0_i32 : i32, i32
  }
}

</mosaic_0001>

<bundles_post_ra>
// kernel: tpu_custom_call.1
= control target key start
LH: loop header
LB: loop body
LE: loop exit
PB: predicated region body
PF: predicated region fallthrough
CT: control target
= control target key end

     0   :  { %8 = vsyncpa [#allocation3], 0  ;;  %s374_s0 = inlined_call_operand.hbm [shape: s32[8,128], index: 0, kind: input, shape index: {}]   ;;  %s375_s1 = inlined_call_operand.hbm [shape: bf16[128,128], index: 1, kind: input, shape index: {}]   ;;  %s376_s2 = inlined_call_operand.vmem [shape: f32[1,128], index: 2, kind: input, shape index: {}]   ;;  %s377_s3 = inlined_call_operand.hbm [shape: f32[8,128], index: 3, kind: output, shape index: {}]  }
   0x1   :  { %9 = vsyncpa [#allocation6], 0 }
   0x2   :  { %10 = vsyncpa [#allocation4], 0  ;;  %s301_s12 = smov [#allocation2]   ;;  %s302_s14 = smov [#allocation5]  }
   0x3   :  { %s17_s13 = sshll.u32 %s301_s12, 4  ;;  %s26_s15 = sshll.u32 %s302_s14, 4  ;;  %s18_s13 = int_to_ptr.vmem [resolvable:$true] %s17_s13  ;;  %s328_s15 = int_to_ptr.vmem [resolvable:$true] %s26_s15 }
   0x4   :  { %s229_s18 = scalar_lea.hbm %s374_s0, 128 }
   0x5   :  { %p230_p0 = scmp.ne.s32.totalorder %s374_s0, %s229_s18  ;;  %p233_p1 = scmp.lt.u32.totalorder %s229_s18, %s374_s0 }
   0x7   :  { %p235_p2 = pnand %p233_p1, %p230_p0 }
   0x9   :  { %238 = shalt.err (!%p235_p2)
}
   0xa   :  { %s239_s23 = scalar_lea.vmem %s18_s13, 128  ;;  %p244_p4 = scmp.lt.s32.totalorder %s18_s13, %s18_s13 }
   0xb   :  { %p240_p3 = scmp.ne.s32.totalorder %s18_s13, %s239_s23  ;;  %p245_p5 = scmp.lt.s32.totalorder %s239_s23, %s239_s23 }
   0xd   :  { %p246_p6 = por %p245_p5, %p244_p4 }
   0xf   :  { %p247_p7 = pnand %p246_p6, %p240_p3 }
  0x11   :  { %250 = shalt.err (!%p247_p7)
}
  0x12   :  { %20 = dma.hbm_to_vmem [thread:$0]  %s374_s0, 128, %s18_s13, [#allocation3]  }
  0x13   :  { %s251_s28 = scalar_lea.hbm %s375_s1, 1024 }
  0x14   :  { %p252_p8 = scmp.ne.s32.totalorder %s375_s1, %s251_s28  ;;  %p255_p9 = scmp.lt.u32.totalorder %s251_s28, %s375_s1 }
  0x16   :  { %p257_p10 = pnand %p255_p9, %p252_p8 }
  0x18   :  { %260 = shalt.err (!%p257_p10)
}
  0x19   :  { %s261_s6 = scalar_lea.vmem %s328_s15, 1024  ;;  %p266_p12 = scmp.lt.s32.totalorder %s328_s15, %s328_s15 }
  0x1a   :  { %p262_p11 = scmp.ne.s32.totalorder %s328_s15, %s261_s6  ;;  %p267_p13 = scmp.lt.s32.totalorder %s261_s6, %s261_s6 }
  0x1c   :  { %p268_p0 = por %p267_p13, %p266_p12 }
  0x1e   :  { %p269_p1 = pnand %p268_p0, %p262_p11 }
  0x20   :  { %272 = shalt.err (!%p269_p1)
}
  0x21   :  { %s303_s0 = smov 64   ;;  %s304_s7 = smov 4  }
  0x22   :  { %32 = dma.hbm_to_vmem [thread:$0]  %s375_s1, 1024, %s328_s15, [#allocation6], %s303_s0, %s303_s0, %s304_s7  }
  0x23   :  { %295 = dma.done.wait [#allocation3], 128  }
  0x24   :  { %296 = vsyncadd [#allocation3], 4294967168 }
  0x25   :  { %297 = dma.done.wait [#allocation6], 1024  }
  0x26   :  { %298 = vsyncadd [#allocation6], 4294966272  ;;  %v305_v0 = vmov 0.0   ;;  %vm306_vm0 = vmmov 0   ;;  %v221_v1 = vld [vmem:[#allocation5] sm:$0xff]   ;;  %v222_v2 = vld [vmem:[#allocation5 + $0x8] sm:$0xff]  }
  0x27   :  { %194 = vmatprep.subr.bf16.mxu0 %v305_v0  ;;  %210 = vmatprep.mubr.msk.bf16.mxu0 %vm306_vm0, %v305_v0  ;;  %v223_v3 = vld [vmem:[#allocation5 + $0x10] sm:$0xff]   ;;  %v224_v4 = vld [vmem:[#allocation5 + $0x18] sm:$0xff]   ;;  %v225_v7 = vld [vmem:[#allocation5 + $0x20] sm:$0xff]   ;;  %s307_s11 = smov [#allocation7]  }
  0x28   :  { %195 = vmatpush3.bf16.msra.mxu0 %v221_v1  ;;  %v42_v5 = vld [vmem:[#allocation2] sm:$0xff]  ;;  %v226_v9 = vld [vmem:[#allocation5 + $0x28] sm:$0xff]   ;;  %v227_v11 = vld [vmem:[#allocation5 + $0x30] sm:$0xff]   ;;  %s166_s12 = sshll.u32 %s307_s11, 4  ;;  %s167_s12 = int_to_ptr.vmem [resolvable:$true] %s166_s12 }
  0x29   :  { %196 = vmatprep.subr.bf16.mxu0 %v305_v0  ;;  %v43_v6 = vand.u32 2147483647, %v42_v5  ;;  %v228_v13 = vld [vmem:[#allocation5 + $0x38] sm:$0xff]   ;;  %s273_s13 = scalar_lea.vmem %s167_s12, 128  ;;  %p278_p3 = scmp.lt.s32.totalorder %s167_s12, %s167_s12 }
  0x2a   :  { %v176_v15 = vld [vmem:[%s376_s2] ss:$0 sm:$0xff]  ;;  %p274_p2 = scmp.ne.s32.totalorder %s167_s12, %s273_s13  ;;  %p279_p4 = scmp.lt.s32.totalorder %s273_s13, %s273_s13 }
  0x2b   :  { %v44_v8 = vshra.s32 %v43_v6, 8 }
  0x2c   :  { %197 = vmatpush3.bf16.msra.mxu0 %v222_v2  ;;  %p280_p5 = por %p279_p4, %p278_p3 }
  0x2d   :  { %198 = vmatprep.subr.bf16.mxu0 %v305_v0  ;;  %v45_v10 = vcvt.s32.f32 %v44_v8 }
  0x2e   :  { %p281_p6 = pnand %p280_p5, %p274_p2 }
  0x2f   :  { %v46_v12 = vmul.f32 1.1920929e-07, %v45_v10 }
  0x30   :  { %199 = vmatpush3.bf16.msra.mxu0 %v223_v3 }
  0x31   :  { %200 = vmatprep.subr.bf16.mxu0 %v305_v0  ;;  %v47_v14 = vpack.c.bf16 %v46_v12, %v46_v12 }
  0x34   :  { %201 = vmatpush3.bf16.msra.mxu0 %v224_v4 }
  0x35   :  { %202 = vmatprep.subr.bf16.mxu0 %v305_v0 }
  0x38   :  { %203 = vmatpush3.bf16.msra.mxu0 %v225_v7 }
  0x39   :  { %204 = vmatprep.subr.bf16.mxu0 %v305_v0 }
  0x3c   :  { %205 = vmatpush3.bf16.msra.mxu0 %v226_v9 }
  0x3d   :  { %206 = vmatprep.subr.bf16.mxu0 %v305_v0 }
  0x40   :  { %207 = vmatpush3.bf16.msra.mxu0 %v227_v11 }
  0x41   :  { %208 = vmatprep.subr.bf16.mxu0 %v305_v0 }
  0x44   :  { %209 = vmatpush3.bf16.msra.mxu0 %v228_v13 }
  0x47   :  { %211 = vmatmul.mubr.bf16.vlgmr.msra.gmra.mrb[0].mxu0 %v47_v14 }
 0x11a   :  { %v153_v16 = vpop.f32.mrb[0].mxu0 }
 0x11b   :  { %v154_v17 = vadd.f32 %v176_v15, %v153_v16  ;;  %v212_v18 = vpop.f32.mrb[1].mxu0 }
 0x11c   :  { %v156_v19 = vpop.f32.mrb[2].mxu0 }
 0x11d   :  { %159 = vst [vmem:[#allocation7] sm:$0xff] %v154_v17  ;;  %v213_v20 = vpop.f32.mrb[3].mxu0 }
 0x11e   :  { %284 = shalt.err (!%p281_p6)
}
 0x11f   :  { %s285_s2 = scalar_lea.hbm %s377_s3, 128 }
 0x120   :  { %p286_p7 = scmp.ne.s32.totalorder %s377_s3, %s285_s2  ;;  %p289_p8 = scmp.lt.u32.totalorder %s285_s2, %s377_s3 }
 0x122   :  { %p291_p9 = pnand %p289_p8, %p286_p7 }
 0x124   :  { %294 = shalt.err (!%p291_p9)
}
 0x125   :  { %169 = dma.vmem_to_hbm [thread:$0]  %s167_s12, 128, %s377_s3, [#allocation4]  }
 0x126   :  { %299 = dma.done.wait [#allocation4], 128  }
 0x127   :  { %300 = vsyncadd [#allocation4], 4294967168 }
 0x128   :  { %173 = vsyncpa [#allocation3], 1 }
 0x129   :  { %174 = vsyncpa [#allocation6], 1 }
 0x12a   :  { %175 = vsyncpa [#allocation4], 1 }

</bundles_post_ra>
